<compile_context>
chip_gen: v7x
topology: tpu7x:2x2x1
jax: 0.10.0
libtpu: 0.0.40
codegen_flags: <defaults>
</compile_context>

<pallas_src>
import functools

import jax
import jax.numpy as jnp
from jax.experimental import pallas as pl
from jax.experimental.pallas import tpu as pltpu


# ---------------------------------------------------------------------------
# Kernel 1: fused multi-head projection  Wh = h @ W_cat,  wha = h @ WA_cat.
# ---------------------------------------------------------------------------
def _proj_kernel(h_ref, w_ref, wa_ref, wh_ref, wh1_ref, wh2t_ref, *, nheads):
    x = h_ref[...].astype(jnp.bfloat16)                       # (tm, Fin) bf16
    # Lane-dense MXU matmuls, f32 accumulation.
    wh = jnp.dot(x, w_ref[...], preferred_element_type=jnp.float32)   # (tm, H*fh)
    wha = jnp.dot(x, wa_ref[...], preferred_element_type=jnp.float32) # (tm, 128)

    wh_ref[...] = wh.astype(wh_ref.dtype)                     # bf16 for MXU reuse
    wh1_ref[...] = wha[:, :nheads]                            # (tm, H) f32
    # Pre-transpose once per row block so the attention inner loop needs no
    # cross-lane shuffle: (tm, H) -> (H, tm).
    wh2t_ref[...] = jnp.transpose(wha[:, nheads:2 * nheads])


# ---------------------------------------------------------------------------
# Kernel 2: tiled masked online-softmax attention + aggregation (all heads).
# ---------------------------------------------------------------------------
def _attn_kernel(bm_ref, fc_ref, wh1_ref, wh2t_ref, whj_ref, adj_ref, out_ref,
                 m_sc, l_sc, acc_sc, *, alpha, nheads, fh, mode, nvalid):
    i = pl.program_id(0)
    j = pl.program_id(1)
    n_col = pl.num_programs(1)

    @pl.when(j == 0)
    def _init():
        m_sc[...] = jnp.full(m_sc.shape, -1e30, jnp.float32)
        l_sc[...] = jnp.zeros(l_sc.shape, jnp.float32)
        acc_sc[...] = jnp.zeros(acc_sc.shape, jnp.float32)

    # Block-sparse skip: only tiles with at least one edge do any work.
    # (Their DMAs are also elided via the fetch-column index maps.)
    @pl.when(bm_ref[i * n_col + j] > 0)
    def _update():
        tm, tn = adj_ref.shape
        edge = adj_ref[...] != 0                              # int8 compare, no f32 cast
        wh1 = wh1_ref[...]                                    # (tm, H) f32
        wh2t = wh2t_ref[...]                                  # (H, tn) f32
        neg = jnp.float32(-1e30)
        alpha_f = jnp.float32(alpha)

        p_list, scale_list = [], []
        for h in range(nheads):                               # static unroll (H small)
            # e_ij = LeakyReLU(wh1_i + wh2_j)
            s = wh1[:, h:h + 1] + wh2t[h:h + 1, :]            # (tm, tn)
            s = jnp.where(s > 0, s, alpha_f * s)
            s = jnp.where(edge, s, neg)

            m_prev = m_sc[h]                                  # (tm, 1)
            m_new = jnp.maximum(m_prev, jnp.max(s, axis=1, keepdims=True))
            # NOTE: keep this where() — rows with no edges in a non-empty tile
            # would otherwise contribute exp(0) == 1.
            p = jnp.where(edge, jnp.exp(s - m_new), 0.0)      # (tm, tn)
            scale = jnp.exp(m_prev - m_new)                   # (tm, 1)

            l_sc[h] = scale * l_sc[h] + jnp.sum(p, axis=1, keepdims=True)
            m_sc[h] = m_new
            p_list.append(p.astype(jnp.bfloat16))
            scale_list.append(jnp.broadcast_to(scale, (tm, fh)))

        whj = whj_ref[...]                                    # (tn, H*fh) bf16
        if nheads == 1:
            pv = jnp.dot(p_list[0], whj, preferred_element_type=jnp.float32)
            scale_cat = scale_list[0]
        else:
            # Fuse all heads into one MXU matmul with a block-diagonal RHS:
            #   [p_0 | ... | p_{H-1}] (tm, H*tn) @ blockdiag(Whj_h) (H*tn, H*fh)
            p_cat = jnp.concatenate(p_list, axis=1)           # (tm, H*tn)
            kdim, ndim = nheads * tn, nheads * fh
            rb = jax.lax.broadcasted_iota(jnp.int32, (kdim, ndim), 0) // tn
            cb = jax.lax.broadcasted_iota(jnp.int32, (kdim, ndim), 1) // fh
            whj_rep = jnp.concatenate([whj] * nheads, axis=0)  # (H*tn, H*fh)
            whj_bd = jnp.where(rb == cb, whj_rep, jnp.zeros_like(whj_rep))
            pv = jnp.dot(p_cat, whj_bd, preferred_element_type=jnp.float32)
            scale_cat = jnp.concatenate(scale_list, axis=1)   # (tm, H*fh)

        acc_sc[...] = scale_cat * acc_sc[...] + pv

    @pl.when(j == n_col - 1)
    def _finalize():
        tm = out_ref.shape[0]
        inv_parts = []
        for h in range(nheads):
            l = l_sc[h]                                       # (tm, 1)
            l_safe = jnp.where(l > 0, l, 1.0)                 # zero-degree rows -> 0 out
            if mode == "elu_logsoftmax":
                inv = 1.0 / l_safe                            # exact: feeds log-probs
            else:
                inv = pl.reciprocal(l_safe, approx=True)
            inv_parts.append(jnp.broadcast_to(inv, (tm, fh)))
        inv_cat = inv_parts[0] if nheads == 1 else jnp.concatenate(inv_parts, axis=1)
        hp = acc_sc[...] * inv_cat                            # (tm, H*fh)

        if mode == "elu":
            y = jnp.where(hp > 0, hp, jnp.exp(jnp.minimum(hp, 0.0)) - 1.0)
        elif mode == "elu_logsoftmax":
            y = jnp.where(hp > 0, hp, jnp.exp(jnp.minimum(hp, 0.0)) - 1.0)
            cols = jax.lax.broadcasted_iota(jnp.int32, y.shape, 1)
            valid = cols < nvalid                             # mask padded class cols
            negf = jnp.float32(-1e30)
            ymax = jnp.max(jnp.where(valid, y, negf), axis=1, keepdims=True)
            ex = jnp.where(valid, jnp.exp(y - ymax), 0.0)
            lse = jnp.log(jnp.sum(ex, axis=1, keepdims=True)) + ymax
            y = jnp.where(valid, y - lse, 0.0)
        else:
            y = hp

        out_ref[...] = y.astype(out_ref.dtype)                # lane-dense store


# ---------------------------------------------------------------------------
# Layer wrapper: projection call + attention call.
# ---------------------------------------------------------------------------
def gat_layer(h, adj, bm_flat, fetch_col, W, WA, *, nheads, fh, alpha, mode,
              nvalid, out_dtype, tm=256, tn=128, vmem_limit=48 << 20):
    N, Fin = h.shape
    HF = nheads * fh
    apad = WA.shape[1]
    assert W.shape == (Fin, HF)
    assert 2 * nheads <= apad
    assert N % tm == 0 and N % tn == 0
    n_row, n_col = N // tm, N // tn

    wh, wh1, wh2t = pl.pallas_call(
        functools.partial(_proj_kernel, nheads=nheads),
        out_shape=(
            jax.ShapeDtypeStruct((N, HF), jnp.bfloat16),
            jax.ShapeDtypeStruct((N, nheads), jnp.float32),
            jax.ShapeDtypeStruct((nheads, N), jnp.float32),
        ),
        grid=(n_row,),
        in_specs=[
            pl.BlockSpec((tm, Fin), lambda i: (i, 0)),
            pl.BlockSpec((Fin, HF), lambda i: (0, 0)),
            pl.BlockSpec((Fin, apad), lambda i: (0, 0)),
        ],
        out_specs=(
            pl.BlockSpec((tm, HF), lambda i: (i, 0)),
            pl.BlockSpec((tm, nheads), lambda i: (i, 0)),
            pl.BlockSpec((nheads, tm), lambda i: (0, i)),
        ),
        compiler_params=pltpu.CompilerParams(
            dimension_semantics=("parallel",),
            vmem_limit_bytes=vmem_limit),
    )(h, W, WA)

    out = pl.pallas_call(
        functools.partial(_attn_kernel, alpha=alpha, nheads=nheads, fh=fh,
                          mode=mode, nvalid=nvalid),
        out_shape=jax.ShapeDtypeStruct((N, HF), out_dtype),
        grid_spec=pltpu.PrefetchScalarGridSpec(
            num_scalar_prefetch=2,           # (block mask, fetch-column table)
            grid=(n_row, n_col),
            in_specs=[
                pl.BlockSpec((tm, nheads), lambda i, j, bm, fc: (i, 0)),
                # For empty tiles fc[i*n_col+j] repeats the previously fetched
                # column block -> Pallas elides the re-DMA of wh2t/whj/adj.
                pl.BlockSpec((nheads, tn),
                             lambda i, j, bm, fc: (0, fc[i * n_col + j])),
                pl.BlockSpec((tn, HF),
                             lambda i, j, bm, fc: (fc[i * n_col + j], 0)),
                pl.BlockSpec((tm, tn),
                             lambda i, j, bm, fc: (i, fc[i * n_col + j])),
            ],
            out_specs=pl.BlockSpec((tm, HF), lambda i, j, bm, fc: (i, 0)),
            scratch_shapes=[
                pltpu.VMEM((nheads, tm, 1), jnp.float32),    # running max
                pltpu.VMEM((nheads, tm, 1), jnp.float32),    # running denom
                pltpu.VMEM((tm, HF), jnp.float32),           # fused accumulator
            ],
        ),
        compiler_params=pltpu.CompilerParams(
            dimension_semantics=("parallel", "arbitrary"),
            vmem_limit_bytes=vmem_limit),
    )(bm_flat, fetch_col, wh1, wh2t, wh, adj)
    return out


# ---------------------------------------------------------------------------
# Parameter init (matches PyTorch xavier_uniform_(gain=1.414)), fused layout.
# ---------------------------------------------------------------------------
def xavier_uniform(key, shape, gain):
    fan_in, fan_out = shape[0], shape[1]
    bound = gain * (6.0 / (fan_in + fan_out)) ** 0.5
    return jax.random.uniform(key, shape, jnp.float32, -bound, bound)


def init_gat_params(key, nfeat, nhid, nclass, nheads, cpad, apad=128, gain=1.414):
    Ws, a1s, a2s = [], [], []
    for _ in range(nheads):
        key, k1, k2 = jax.random.split(key, 3)
        W = xavier_uniform(k1, (nfeat, nhid), gain)
        a = xavier_uniform(k2, (2 * nhid, 1), gain)
        Ws.append(W)
        a1s.append(a[:nhid, 0])
        a2s.append(a[nhid:, 0])
    W1 = jnp.concatenate(Ws, axis=1)                          # (nfeat, H*nhid)
    # Fold the attention vectors into the projection: (h@W)@a == h@(W@a).
    WA1 = jnp.zeros((nfeat, apad), jnp.float32)
    for h in range(nheads):
        WA1 = WA1.at[:, h].set(Ws[h] @ a1s[h])
        WA1 = WA1.at[:, nheads + h].set(Ws[h] @ a2s[h])

    key, k1, k2 = jax.random.split(key, 3)
    Wo = xavier_uniform(k1, (nhid * nheads, nclass), gain)
    ao = xavier_uniform(k2, (2 * nclass, 1), gain)
    # Zero-pad the class dim to a lane-dense width; padded cols are masked out
    # of the in-kernel log_softmax and sliced off by the caller.
    W2 = jnp.zeros((nhid * nheads, cpad), jnp.float32).at[:, :nclass].set(Wo)
    WA2 = jnp.zeros((nhid * nheads, apad), jnp.float32)
    WA2 = WA2.at[:, 0].set(Wo @ ao[:nclass, 0])
    WA2 = WA2.at[:, 1].set(Wo @ ao[nclass:, 0])
    return {"W1": W1.astype(jnp.bfloat16), "WA1": WA1.astype(jnp.bfloat16),
            "W2": W2.astype(jnp.bfloat16), "WA2": WA2.astype(jnp.bfloat16)}


# ---------------------------------------------------------------------------
# Full GAT forward (eval mode).
# ---------------------------------------------------------------------------
def gat_forward(x, adj, params, *, alpha, nheads, nhid, nclass, cpad,
                tm=256, tn=128):
    # F.dropout in eval mode -> identity.
    N = x.shape[0]
    n_row, n_col = N // tm, N // tn

    # Per-(row-block, col-block) edge presence, flattened 1-D (avoids 2-D SMEM
    # padding blow-up), plus the "fetch column" table: where a tile is empty it
    # carries the previously fetched column block forward so its DMA is elided.
    blk = adj.astype(jnp.int32).reshape(n_row, tm, n_col, tn).sum(axis=(1, 3))
    bm_flat = (blk.reshape(-1) > 0).astype(jnp.int32)          # (n_row*n_col,)
    j_idx = jnp.tile(jnp.arange(n_col, dtype=jnp.int32), n_row)

    def carry_fn(c, xs):
        b, jj = xs
        nxt = jnp.where(b > 0, jj, c)
        return nxt, nxt

    _, fetch_col = jax.lax.scan(carry_fn, jnp.int32(0), (bm_flat, j_idx))

    # Layer 1: all heads fused, ELU in-kernel, bf16 activation slab out.
    x_b = x.astype(jnp.bfloat16)
    h1 = gat_layer(x_b, adj, bm_flat, fetch_col,
                   params["W1"], params["WA1"],
                   nheads=nheads, fh=nhid, alpha=alpha, mode="elu",
                   nvalid=nheads * nhid, out_dtype=jnp.bfloat16, tm=tm, tn=tn)

    # Output attention layer (concat=False) + outer ELU + log_softmax fused.
    out = gat_layer(h1, adj, bm_flat, fetch_col,
                    params["W2"], params["WA2"],
                    nheads=1, fh=cpad, alpha=alpha, mode="elu_logsoftmax",
                    nvalid=nclass, out_dtype=jnp.float32, tm=tm, tn=tn)
    return out                                                 # (N, cpad)


# ---------------------------------------------------------------------------
# Pure-JAX reference (matching the kernel's bf16 rounding points).
# ---------------------------------------------------------------------------
def ref_gat_forward(x, adj, params, *, alpha, nheads, nhid, nclass):
    mask = adj != 0

    def layer(h, Wb, WAb, H, fh):
        hb = h.astype(jnp.bfloat16)
        Wh = jnp.dot(hb, Wb, preferred_element_type=jnp.float32)
        wha = jnp.dot(hb, WAb, preferred_element_type=jnp.float32)
        outs = []
        for hh in range(H):
            e = wha[:, hh:hh + 1] + wha[:, H + hh:H + hh + 1].T
            e = jnp.where(e > 0, e, alpha * e)
            e = jnp.where(mask, e, -1e30)
            m = jnp.max(e, axis=1, keepdims=True)
            p = jnp.where(mask, jnp.exp(e - m), 0.0)
            den = jnp.sum(p, axis=1, keepdims=True)
            p = p / jnp.where(den > 0, den, 1.0)
            outs.append(jnp.dot(p.astype(jnp.bfloat16),
                                Wh[:, hh * fh:(hh + 1) * fh].astype(jnp.bfloat16),
                                preferred_element_type=jnp.float32))
        return outs[0] if H == 1 else jnp.concatenate(outs, axis=1)

    def elu(v):
        return jnp.where(v > 0, v, jnp.exp(jnp.minimum(v, 0.0)) - 1.0)

    h1 = elu(layer(x, params["W1"], params["WA1"], nheads, nhid)).astype(jnp.bfloat16)
    h2 = elu(layer(h1, params["W2"], params["WA2"], 1, params["W2"].shape[1]))
    return jax.nn.log_softmax(h2[:, :nclass], axis=1)


if __name__ == "__main__":
    # Small deterministic problem; shapes chosen to exercise block-sparse skip.
    N_NODE, N_FEAT, N_HID, N_CLASS, N_HEADS = 300, 128, 64, 4, 2
    ALPHA = 0.2
    TM, TN = 256, 128
    C_PAD = 128

    N_PAD = ((N_NODE + TM - 1) // TM) * TM       # pad node dim to tile multiple

    key = jax.random.PRNGKey(0)
    key, kx = jax.random.split(key)
    x = jax.random.normal(kx, (N_NODE, N_FEAT), dtype=jnp.float32)
    x_pad = jnp.zeros((N_PAD, N_FEAT), jnp.float32).at[:N_NODE].set(x)

    # Deterministic edge set: self-loops + bidirectional ring.
    src, dst = [], []
    for i in range(N_NODE):
        src += [i, i, i]
        dst += [i, (i + 1) % N_NODE, (i - 1) % N_NODE]
    edge_index = jnp.array([src, dst], dtype=jnp.int32)         # (2, E)

    # Dense int8 adjacency mask from edge_index (glue, plain JAX).
    adj = jnp.zeros((N_PAD, N_PAD), jnp.int8)
    adj = adj.at[edge_index[0], edge_index[1]].set(1)

    params = init_gat_params(key, N_FEAT, N_HID, N_CLASS, N_HEADS, C_PAD)

    out_pad = gat_forward(x_pad, adj, params, alpha=ALPHA, nheads=N_HEADS,
                          nhid=N_HID, nclass=N_CLASS, cpad=C_PAD, tm=TM, tn=TN)
    out_pad = jax.block_until_ready(out_pad)
    out = out_pad[:N_NODE, :N_CLASS]

    ref = ref_gat_forward(x_pad, adj, params, alpha=ALPHA, nheads=N_HEADS,
                          nhid=N_HID, nclass=N_CLASS)[:N_NODE]

    assert out.shape == (N_NODE, N_CLASS)
    assert bool(jnp.all(jnp.isfinite(out)))
    # log_softmax rows must exponentiate to a probability distribution.
    assert bool(jnp.all(jnp.abs(jnp.sum(jnp.exp(out), axis=1) - 1.0) < 1e-3))
    # Match the bf16-precision reference (catches structural errors).
    assert float(jnp.max(jnp.abs(out - ref))) < 1e-1
    print("KERNEL_OK")
</pallas_src>

<mosaic_0001>
module attributes {stable_mosaic.version = 11 : i64} {
  func.func @_proj_kernel(%arg0: i32, %arg1: memref<256x128xbf16, #tpu.memory_space<vmem>>, %arg2: memref<128x128xbf16, #tpu.memory_space<vmem>>, %arg3: memref<128x128xbf16, #tpu.memory_space<vmem>>, %arg4: memref<256x128xbf16, #tpu.memory_space<vmem>>, %arg5: memref<256x2xf32, #tpu.memory_space<vmem>>, %arg6: memref<2x256xf32, #tpu.memory_space<vmem>>) attributes {dimension_semantics = [#tpu.dimension_semantics<parallel>], iteration_bounds = array<i64: 2>, scalar_prefetch = 0 : i64, scratch_operands = 0 : i64, tpu.core_type = #tpu.core_type<tc>, window_params = [{transform_indices = @transform_0, window_bounds = array<i64: 256, 128>}, {pipeline_mode = #tpu.pipeline_mode<synchronous>, transform_indices = @transform_1, window_bounds = array<i64: 128, 128>}, {pipeline_mode = #tpu.pipeline_mode<synchronous>, transform_indices = @transform_2, window_bounds = array<i64: 128, 128>}, {transform_indices = @transform_3, window_bounds = array<i64: 256, 128>}, {transform_indices = @transform_4, window_bounds = array<i64: 256, 2>}, {transform_indices = @transform_5, window_bounds = array<i64: 2, 256>}]} {
    %c0 = arith.constant 0 : index
    %c0_0 = arith.constant 0 : index
    %0 = vector.load %arg1[%c0, %c0_0] : memref<256x128xbf16, #tpu.memory_space<vmem>>, vector<256x128xbf16>
    %c0_1 = arith.constant 0 : index
    %c0_2 = arith.constant 0 : index
    %1 = vector.load %arg2[%c0_1, %c0_2] : memref<128x128xbf16, #tpu.memory_space<vmem>>, vector<128x128xbf16>
    %cst = arith.constant dense<0.000000e+00> : vector<256x128xf32>
    %2 = tpu.matmul %0, %1, %cst {dimension_numbers = #tpu.dot_dimension_numbers<[1], [0], [0], [1], [0, 0, 1, 1], [], []>} : vector<256x128xbf16>, vector<128x128xbf16>, vector<256x128xf32> -> vector<256x128xf32>
    %c0_3 = arith.constant 0 : index
    %c0_4 = arith.constant 0 : index
    %3 = vector.load %arg3[%c0_3, %c0_4] : memref<128x128xbf16, #tpu.memory_space<vmem>>, vector<128x128xbf16>
    %cst_5 = arith.constant dense<0.000000e+00> : vector<256x128xf32>
    %4 = tpu.matmul %0, %3, %cst_5 {dimension_numbers = #tpu.dot_dimension_numbers<[1], [0], [0], [1], [0, 0, 1, 1], [], []>} : vector<256x128xbf16>, vector<128x128xbf16>, vector<256x128xf32> -> vector<256x128xf32>
    %5 = arith.truncf %2 : vector<256x128xf32> to vector<256x128xbf16>
    %c0_6 = arith.constant 0 : index
    %c0_7 = arith.constant 0 : index
    %6 = vector.load %arg4[%c0_6, %c0_7] : memref<256x128xbf16, #tpu.memory_space<vmem>>, vector<256x128xbf16>
    tpu.vector_store %arg4[%c0_6, %c0_7], %5 {strides = array<i32>} : memref<256x128xbf16, #tpu.memory_space<vmem>>, vector<256x128xbf16>,
    %7 = vector.extract_strided_slice %4 {offsets = [0, 0], sizes = [256, 2], strides = [1, 1]} : vector<256x128xf32> to vector<256x2xf32>
    %c0_8 = arith.constant 0 : index
    %c0_9 = arith.constant 0 : index
    %8 = vector.load %arg5[%c0_8, %c0_9] : memref<256x2xf32, #tpu.memory_space<vmem>>, vector<256x2xf32>
    tpu.vector_store %arg5[%c0_8, %c0_9], %7 {strides = array<i32>} : memref<256x2xf32, #tpu.memory_space<vmem>>, vector<256x2xf32>,
    %9 = vector.extract_strided_slice %4 {offsets = [0, 2], sizes = [256, 2], strides = [1, 1]} : vector<256x128xf32> to vector<256x2xf32>
    %10 = tpu.transpose %9, [1, 0] : vector<256x2xf32> -> vector<2x256xf32>
    %c0_10 = arith.constant 0 : index
    %c0_11 = arith.constant 0 : index
    %11 = vector.load %arg6[%c0_10, %c0_11] : memref<2x256xf32, #tpu.memory_space<vmem>>, vector<2x256xf32>
    tpu.vector_store %arg6[%c0_10, %c0_11], %10 {strides = array<i32>} : memref<2x256xf32, #tpu.memory_space<vmem>>, vector<2x256xf32>,
    return
  }
  func.func @transform_0(%arg0: i32) -> (i32, i32) {
    %c0_i32 = arith.constant 0 : i32
    %c0_i32_0 = arith.constant 0 : i32
    return %arg0, %c0_i32 : i32, i32
  }
  func.func @transform_1(%arg0: i32) -> (i32, i32) {
    %c0_i32 = arith.constant 0 : i32
    %c0_i32_0 = arith.constant 0 : i32
    %c0_i32_1 = arith.constant 0 : i32
    return %c0_i32, %c0_i32_0 : i32, i32
  }
  func.func @transform_2(%arg0: i32) -> (i32, i32) {
    %c0_i32 = arith.constant 0 : i32
    %c0_i32_0 = arith.constant 0 : i32
    %c0_i32_1 = arith.constant 0 : i32
    return %c0_i32, %c0_i32_0 : i32, i32
  }
  func.func @transform_3(%arg0: i32) -> (i32, i32) {
    %c0_i32 = arith.constant 0 : i32
    %c0_i32_0 = arith.constant 0 : i32
    return %arg0, %c0_i32 : i32, i32
  }
  func.func @transform_4(%arg0: i32) -> (i32, i32) {
    %c0_i32 = arith.constant 0 : i32
    %c0_i32_0 = arith.constant 0 : i32
    return %arg0, %c0_i32 : i32, i32
  }
  func.func @transform_5(%arg0: i32) -> (i32, i32) {
    %c0_i32 = arith.constant 0 : i32
    %c0_i32_0 = arith.constant 0 : i32
    return %c0_i32, %arg0 : i32, i32
  }
}

</mosaic_0001>

<bundles_post_ra>
// kernel: tpu_custom_call.1
= control target key start
LH: loop header
LB: loop body
LE: loop exit
PB: predicated region body
PF: predicated region fallthrough
CT: control target
= control target key end

     0   :  { %11 = vsyncpa [#allocation3], 0  ;;  %s2588_s0 = inlined_call_operand.hbm [shape: bf16[512,128], index: 0, kind: input, shape index: {}]   ;;  %s2589_s1 = inlined_call_operand.hbm [shape: bf16[128,128], index: 1, kind: input, shape index: {}]   ;;  %s2590_s2 = inlined_call_operand.hbm [shape: bf16[128,128], index: 2, kind: input, shape index: {}]   ;;  %s2591_s3 = inlined_call_operand.hbm [shape: bf16[512,128], index: 3, kind: output, shape index: {0}]   ;;  %s2592_s4 = inlined_call_operand.vmem [shape: f32[512,2], index: 4, kind: output, shape index: {1}]   ;;  %s2593_s5 = inlined_call_operand.hbm [shape: f32[2,512], index: 5, kind: output, shape index: {2}]  }
   0x1   :  { %13 = vsyncpa [#allocation3 + $0x1], 0 }
   0x2   :  { %14 = vsyncpa [#allocation6], 0 }
   0x3   :  { %15 = vsyncpa [#allocation4], 0 }
   0x4   :  { %17 = vsyncpa [#allocation4 + $0x1], 0 }
   0x5   :  { %18 = vsyncpa [#allocation10], 0 }
   0x6   :  { %20 = vsyncpa [#allocation10 + $0x1], 0  ;;  %s2168_s18 = smov 0   ;;  %s2170_s19 = smov 0  }
   0x7   :  { %s2172_s20 = smov 0   ;;  %s2174_s21 = smov 0  }
   0x8 LB: > { %s2189_s22 = sadd.s32 4294967295, %s2126_s21   ;;  %s1466_s23 = sadd.s32 4294967294, %s2126_s21   ;;  %s2126_s21 = sphi %s2174_s21, %s2613_s21   ;;  %s2122_s20 = sphi %s2172_s20, %s2612_s20   ;;  %s2118_s19 = sphi %s2170_s19, %s2611_s19   ;;  %s2114_s18 = sphi %s2168_s18, %s2610_s18  }
   0x9   : > { %p46_p0 = scmp.ne.s32.totalorder %s2118_s19, %s2114_s18  ;;  %p2594_p1 = scmp.eq.s32.totalorder %s2189_s22, 0 }
   0xa   : > { %p118_p3 = scmp.eq.s32.totalorder %s1466_s23, 1  ;;  %p1467_p5 = scmp.ge.s32.totalorder %s2126_s21, 1 }
   0xb   : > { %p2198_p4 = por %p2594_p1, %p46_p0  ;;  %p177_p7 = scmp.lt.s32.totalorder %s2126_s21, 3 }
   0xc   : > { %p2203_p6 = por %p118_p3, %p46_p0  ;;  %s2128_s27 = smov [#allocation5]  }
   0xd   : > { %s2597_s24 = scalar_select %p2198_p4, 1, 0 }
   0xe   : > { %s2598_s25 = scalar_select %p2203_p6, 1, 0 }
   0xf   : > { %p2208_p8 = pnand %p1467_p5, %p177_p7  ;;  %s189_s28 = sshll.u32 %s2128_s27, 4  ;;  %s2212_s28 = int_to_ptr.vmem [resolvable:$true] %s189_s28 }
  0x10   : > { %s2129_s30 = smov [#allocation7]   ;;  %s1938_s9 = scalar_lea.hbm %s2589_s1, 1024 }
  0x11   : > { %p1843_p9 = pneg %p2208_p8  ;;  %s202_s6 = sshll.u32 %s2129_s30, 4  ;;  %s2223_s6 = int_to_ptr.vmem [resolvable:$true] %s202_s6 }
  0x12   : > { %p1939_p12 = scmp.ne.s32.totalorder %s2589_s1, %s1938_s9  ;;  %p1945_p5 = scmp.lt.u32.totalorder %s1938_s9, %s2589_s1 }
  0x13   : > { %p2219_p11 = pnand %p1843_p9, %p2594_p1 }
  0x15   : > { %p1940_p13 = pneg %p2219_p11 }
  0x17   : > { %p1941_p0 = pnand %p1940_p13, %p1939_p12 }
  0x19   : > { %p1942_p3 = pneg %p1941_p0 }
  0x1b   : > { %p1947_p7 = pnand %p1945_p5, %p1942_p3 }
  0x1d   : > { %1950 = shalt.err (!%p1947_p7)
}
  0x1e   : > { %s1951_s14 = scalar_lea.vmem %s2212_s28, 1024  ;;  %p1959_p2 = scmp.lt.s32.totalorder %s2212_s28, %s2212_s28 }
  0x1f   : > { %p1952_p9 = scmp.ne.s32.totalorder %s2212_s28, %s1951_s14  ;;  %p1960_p12 = scmp.lt.s32.totalorder %s1951_s14, %s1951_s14 }
  0x21   : > { %p1954_p10 = pnand %p1952_p9, %p1940_p13  ;;  %p1961_p0 = por %p1960_p12, %p1959_p2 }
  0x23   : > { %p1955_p1 = pneg %p1954_p10 }
  0x25   : > { %p1962_p6 = pnand %p1961_p0, %p1955_p1 }
  0x27   : > { %1965 = shalt.err (!%p1962_p6)
}
  0x28   : > { %s2130_s15 = smov 64   ;;  %s2131_s16 = smov 4  }
  0x29   : > { %1846 = dma.hbm_to_vmem [thread:$0]  (!%p2219_p11), %s2589_s1, 1024, %s2212_s28, [#allocation6], %s2130_s15, %s2130_s15, %s2131_s16  }
  0x2a   : > { %s1966_s7 = scalar_lea.hbm %s2590_s2, 1024 }
  0x2b   : > { %p1967_p1 = scmp.ne.s32.totalorder %s2590_s2, %s1966_s7  ;;  %p1973_p10 = scmp.lt.u32.totalorder %s1966_s7, %s2590_s2 }
  0x2d   : > { %p1969_p2 = pnand %p1967_p1, %p1940_p13 }
  0x2f   : > { %p1970_p6 = pneg %p1969_p2 }
  0x31   : > { %p1975_p3 = pnand %p1973_p10, %p1970_p6 }
  0x33   : > { %1978 = shalt.err (!%p1975_p3)
}
  0x34   : > { %s1979_s28 = scalar_lea.vmem %s2223_s6, 1024  ;;  %p1987_p12 = scmp.lt.s32.totalorder %s2223_s6, %s2223_s6 }
  0x35   : > { %p1980_p5 = scmp.ne.s32.totalorder %s2223_s6, %s1979_s28  ;;  %p1988_p0 = scmp.lt.s32.totalorder %s1979_s28, %s1979_s28 }
  0x37   : > { %p1982_p7 = pnand %p1980_p5, %p1940_p13  ;;  %p1989_p1 = por %p1988_p0, %p1987_p12 }
  0x39   : > { %p1983_p9 = pneg %p1982_p7 }
  0x3b   : > { %p1990_p2 = pnand %p1989_p1, %p1983_p9 }
  0x3d   : > { %1993 = shalt.err (!%p1990_p2)
}
  0x3e   : > { %1849 = dma.hbm_to_vmem [thread:$0]  (!%p2219_p11), %s2590_s2, 1024, %s2223_s6, [#allocation6], %s2130_s15, %s2130_s15, %s2131_s16  }
  0x3f   : > { %s2284_s29 = sadd.s32 1, %s2126_s21   ;;  %s33_s14 = sadd.s32 1, %s2122_s20 }
  0x40   : > { %s30_s17 = ssub.s32 %s2126_s21, %s2284_s29  ;;  %p40_p13 = scmp.ne.s32.totalorder %s2122_s20, %s2118_s19 }
  0x41   : > { %p31_p6 = scmp.eq.s32.totalorder %s30_s17, 0  ;;  %p41_p10 = scmp.eq.s32.totalorder %s2126_s21, 0 }
  0x42   : > { %p2601_p3 = scmp.eq.s32.totalorder %s2189_s22, 1  ;;  %p1863_p7 = scmp.lt.s32.totalorder %s2126_s21, 2 }
  0x43   : > { %s2300_s27 = scalar_select %p31_p6, %s2122_s20, %s33_s14  }
  0x44   : > { %p2294_p5 = por %p2601_p3, %p40_p13  ;;  %p42_p9 = por %p41_p10, %p40_p13 }
  0x45   : > { %s216_s30 = sand.u32 1, %s2122_s20   ;;  %s1555_s6 = sshll.u32 %s2126_s21, 11 }
  0x46   : > { %s2602_s23 = scalar_select %p2294_p5, 1, 0 }
  0x47   : > { %s1471_s7 = sshll.u32 %s216_s30, 7  ;;  %s2307_s10 = scalar_lea.hbm %s2588_s0, %s1555_s6 }
  0x48   : > { %s220_s11 = scalar_lea.vmem [#allocation2], %s1471_s7  ;;  %p2311_p11 = pnand %p1863_p7, %p42_p9 }
  0x49   : > { %s227_s28 = sshll.u32 %s220_s11, 4  ;;  %s2315_s13 = scalar_lea.sflag [#allocation3], %s216_s30  ;;  %s2309_s28 = int_to_ptr.vmem [resolvable:$true] %s227_s28 }
  0x4a   : > { %s1994_s14 = scalar_lea.hbm %s2307_s10, 2048  ;;  %p1996_p0 = pneg %p2311_p11 }
  0x4b   : > { %p1995_p12 = scmp.ne.s32.totalorder %s2307_s10, %s1994_s14  ;;  %s1999_s6 = scalar_lea.hbm %s2588_s0, 4096 }
  0x4c   : > { %p2000_p13 = scmp.lt.u32.totalorder %s2307_s10, %s2588_s0  ;;  %p2001_p6 = scmp.lt.u32.totalorder %s1999_s6, %s1994_s14 }
  0x4d   : > { %p1997_p1 = pnand %p1996_p0, %p1995_p12  ;;  %p2003_p3 = scmp.lt.u32.totalorder %s1994_s14, %s2307_s10 }
  0x4e   : > { %p2002_p10 = por %p2001_p6, %p2000_p13 }
  0x4f   : > { %p1998_p2 = pneg %p1997_p1 }
  0x50   : > { %p2004_p7 = por %p2003_p3, %p2002_p10 }
  0x52   : > { %p2005_p9 = pnand %p2004_p7, %p1998_p2 }
  0x54   : > { %2008 = shalt.err (!%p2005_p9)
}
  0x55   : > { %s2009_s30 = scalar_lea.vmem %s2309_s28, 2048  ;;  %s2132_s11 = smov [#allocation2]  }
  0x56   : > { %p2010_p12 = scmp.ne.s32.totalorder %s2309_s28, %s2009_s30  ;;  %s2014_s17 = sshll.u32 %s2132_s11, 4  ;;  %s2015_s17 = int_to_ptr.vmem [resolvable:$false] %s2014_s17 }
  0x57   : > { %s2016_s7 = scalar_lea.vmem %s2015_s17, 4096  ;;  %p2017_p4 = scmp.lt.s32.totalorder %s2309_s28, %s2015_s17 }
  0x58   : > { %p2012_p1 = pnand %p2010_p12, %p1996_p0  ;;  %p2018_p13 = scmp.lt.s32.totalorder %s2016_s7, %s2009_s30 }
  0x5a   : > { %p2013_p5 = pneg %p2012_p1  ;;  %p2019_p6 = por %p2018_p13, %p2017_p4 }
  0x5c   : > { %p2020_p10 = pnand %p2019_p6, %p2013_p5 }
  0x5e   : > { %2023 = shalt.err (!%p2020_p10)
}
  0x5f   : > { %1853 = dma.hbm_to_vmem [thread:$0]  (!%p2311_p11), %s2307_s10, 2048, %s2309_s28, %s2315_s13, %s2130_s15, %s2130_s15, %s2131_s16  }
  0x60   : > { %239 = sbr.rel (%p2208_p8) target bundleno = 674 (0x2a2), region = 32  ;;  %s2349_s14 = sand.u32 (!%p2208_p8), 1, %s2118_s19  }
  0x61   : > { %s1475_s6 = sshll.u32 (!%p2208_p8), %s2349_s14, 7  ;;  %s242_s8 = scalar_lea.sflag (!%p2208_p8), [#allocation3], %s2349_s14 }
  0x62   : > { %s2355_s12 = scalar_lea.vmem (!%p2208_p8), [#allocation2], %s1475_s6  ;;  %p2604_p4 = scmp.ne.s32.totalorder (!%p2208_p8), %s2597_s24, 0 }
  0x67   : > { %2097 = dma.done.wait (%p2604_p4), %s242_s8, 2048  }
  0x68   : > { %2099 = vsyncadd (%p2604_p4), %s242_s8, 4294965248  ;;  %p2605_p5 = scmp.eq.s32.totalorder %s2189_s22, 0 }
  0x6a   : > { %2101 = dma.done.wait (%p2605_p5), [#allocation6], 2048   ;;  %p2606_p8 = pmov %p2605_p5 }
  0x6b   : > { %v1906_v0 = vld [vmem:[#allocation7] sm:$0xff]   ;;  %v1907_v1 = vld [vmem:[#allocation7 + $0x8] sm:$0xff]   ;;  %v1908_v2 = vld [vmem:[#allocation7 + $0x10] sm:$0xff]   ;;  %s1480_s24 = sshll.u32 %s2189_s22, 5  ;;  %vm1038_vm0 = vcmask 15360   ;;  %s2133_s28 = smov 126  }
  0x6c   : > { %2103 = vsyncadd (%p2606_p8), [#allocation6], 4294965248  ;;  %1781 = vmatprep.subr.bf16.mxu1 %v1906_v0  ;;  %v1909_v3 = vld [vmem:[#allocation7 + $0x18] sm:$0xff]   ;;  %v1914_v4 = vld [vmem:[%s2355_s12] sm:$0xff]   ;;  %p293_p11 = scmp.lt.s32.totalorder %s1480_s24, 63  ;;  %s2485_s13 = scalar_lea.vmem [#allocation8], %s1475_s6 }
  0x6d   : > { %1782 = vmatpush3.bf16.msra.mxu1 %v1906_v0  ;;  %1797 = vmatprep.mubr.bf16.mxu1 %v1914_v4  ;;  %v1910_v5 = vld [vmem:[#allocation7 + $0x20] sm:$0xff]   ;;  %v1911_v6 = vld [vmem:[#allocation7 + $0x28] sm:$0xff]   ;;  %v1912_v7 = vld [vmem:[#allocation7 + $0x30] sm:$0xff]   ;;  %s1588_s9 = sshll.u32 %s2189_s22, 11  ;;  %s1299_s30 = sshll.u32 %s2485_s13, 4  ;;  %s2512_s30 = int_to_ptr.vmem [resolvable:$true] %s1299_s30 }
  0x6e   : > { %1783 = vmatprep.subr.bf16.mxu1 %v1907_v1  ;;  %1749 = vmatprep.mubr.bf16.mxu0 %v1914_v4  ;;  %v1913_v8 = vld [vmem:[#allocation7 + $0x38] sm:$0xff]   ;;  %v1930_v9 = vld [vmem:[#allocation5] sm:$0xff]   ;;  %v1931_v10 = vld [vmem:[#allocation5 + $0x8] sm:$0xff]   ;;  %s2615_s24 = smov (!%p293_p11, %s1480_s24), 63  ;;  %s2510_s7 = scalar_lea.hbm %s2591_s3, %s1588_s9 }
  0x6f   : > { %1733 = vmatprep.subr.bf16.mxu0 %v1930_v9  ;;  %v1932_v11 = vld [vmem:[#allocation5 + $0x10] sm:$0xff]   ;;  %v1915_v12 = vld [vmem:[%s2355_s12 + $0x8] sm:$0xff]   ;;  %v1917_v14 = vld [vmem:[%s2355_s12 + $0x18] sm:$0xff]   ;;  %s1481_s26 = sshll.u32 %s2615_s24, 3  ;;  %s1276_s6 = scalar_lea.sflag [#allocation4], %s2349_s14 }
  0x70   : > { %1734 = vmatpush3.bf16.msra.mxu0 %v1930_v9  ;;  %v1916_v13 = vld [vmem:[%s2355_s12 + $0x10] sm:$0xff]   ;;  %v1918_v15 = vld [vmem:[%s2355_s12 + $0x20] sm:$0xff]   ;;  %v1919_v16 = vld [vmem:[%s2355_s12 + $0x28] sm:$0xff]   ;;  %s2385_s10 = scalar_lea.vmem %s2592_s4, %s1481_s26  ;;  %s2024_s8 = scalar_lea.vmem %s2512_s30, 2048 }
  0x71   : > { %1784 = vmatpush3.bf16.msra.mxu1 %v1907_v1  ;;  %1735 = vmatprep.subr.bf16.mxu0 %v1931_v10  ;;  %v1920_v17 = vld [vmem:[%s2355_s12 + $0x30] sm:$0xff]   ;;  %v1921_v18 = vld [vmem:[%s2355_s12 + $0x38] sm:$0xff]   ;;  %v1922_v19 = vld [vmem:[%s2355_s12 + $0x40] sm:$0xff]   ;;  %p2025_p0 = scmp.ne.s32.totalorder %s2512_s30, %s2024_s8  ;;  %p2607_p2 = scmp.ne.s32.totalorder %s2602_s23, 0 }
  0x72   : > { %1785 = vmatprep.subr.bf16.mxu1 %v1908_v2  ;;  %v1923_v20 = vld [vmem:[%s2355_s12 + $0x48] sm:$0xff]   ;;  %v1924_v21 = vld [vmem:[%s2355_s12 + $0x50] sm:$0xff]   ;;  %v1925_v22 = vld [vmem:[%s2355_s12 + $0x58] sm:$0xff]  }
  0x73   : > { %v1926_v23 = vld [vmem:[%s2355_s12 + $0x60] sm:$0xff]   ;;  %v1927_v24 = vld [vmem:[%s2355_s12 + $0x68] sm:$0xff]   ;;  %v1928_v25 = vld [vmem:[%s2355_s12 + $0x70] sm:$0xff]   ;;  %p2026_p3 = pnand %p2025_p0, %p2607_p2 }
  0x74   : > { %1736 = vmatpush3.bf16.msra.mxu0 %v1931_v10  ;;  %v1929_v26 = vld [vmem:[%s2355_s12 + $0x78] sm:$0xff]   ;;  %v1934_v28 = vld [vmem:[#allocation5 + $0x20] sm:$0xff]   ;;  %v1935_v29 = vld [vmem:[#allocation5 + $0x28] sm:$0xff]   ;;  %s2134_s12 = smov [#allocation8]  }
  0x75   : > { %1786 = vmatpush3.bf16.msra.mxu1 %v1908_v2  ;;  %1737 = vmatprep.subr.bf16.mxu0 %v1932_v11  ;;  %v1933_v27 = vld [vmem:[#allocation5 + $0x18] sm:$0xff]   ;;  %v1936_v30 = vld [vmem:[#allocation5 + $0x30] sm:$0xff]   ;;  %p2027_p7 = pneg %p2026_p3  ;;  %s2028_s24 = sshll.u32 %s2134_s12, 4  ;;  %s2029_s24 = int_to_ptr.vmem [resolvable:$false] %s2028_s24 }
  0x76   : > { %1787 = vmatprep.subr.bf16.mxu1 %v1909_v3  ;;  %v1937_v31 = vld [vmem:[#allocation5 + $0x38] sm:$0xff]   ;;  %s2030_s26 = scalar_lea.vmem %s2029_s24, 4096  ;;  %p2031_p9 = scmp.lt.s32.totalorder %s2512_s30, %s2029_s24 }
  0x77   : > { %p2032_p12 = scmp.lt.s32.totalorder %s2030_s26, %s2024_s8 }
  0x78   : > { %1738 = vmatpush3.bf16.msra.mxu0 %v1932_v11 }
  0x79   : > { %1788 = vmatpush3.bf16.msra.mxu1 %v1909_v3  ;;  %1739 = vmatprep.subr.bf16.mxu0 %v1933_v27  ;;  %p2033_p1 = por %p2032_p12, %p2031_p9 }
  0x7a   : > { %1789 = vmatprep.subr.bf16.mxu1 %v1910_v5 }
  0x7b   : > { %p2034_p13 = pnand %p2033_p1, %p2027_p7 }
  0x7c   : > { %1740 = vmatpush3.bf16.msra.mxu0 %v1933_v27 }
  0x7d   : > { %1790 = vmatpush3.bf16.msra.mxu1 %v1910_v5  ;;  %1741 = vmatprep.subr.bf16.mxu0 %v1934_v28 }
  0x7e   : > { %1791 = vmatprep.subr.bf16.mxu1 %v1911_v6 }
  0x80   : > { %1742 = vmatpush3.bf16.msra.mxu0 %v1934_v28 }
  0x81   : > { %1792 = vmatpush3.bf16.msra.mxu1 %v1911_v6  ;;  %1743 = vmatprep.subr.bf16.mxu0 %v1935_v29 }
  0x82   : > { %1793 = vmatprep.subr.bf16.mxu1 %v1912_v7 }
  0x84   : > { %1744 = vmatpush3.bf16.msra.mxu0 %v1935_v29 }
  0x85   : > { %1794 = vmatpush3.bf16.msra.mxu1 %v1912_v7  ;;  %1745 = vmatprep.subr.bf16.mxu0 %v1936_v30 }
  0x86   : > { %1795 = vmatprep.subr.bf16.mxu1 %v1913_v8 }
  0x88   : > { %1746 = vmatpush3.bf16.msra.mxu0 %v1936_v30 }
  0x89   : > { %1796 = vmatpush3.bf16.msra.mxu1 %v1913_v8  ;;  %1747 = vmatprep.subr.bf16.mxu0 %v1937_v31 }
  0x8c   : > { %1798 = vmatmul.mubr.bf16.vlgmr.msra.gmra.mrb[0].mxu1 %v1915_v12  ;;  %1748 = vmatpush3.bf16.msra.mxu0 %v1937_v31 }
  0x8d   : > { %1801 = vmatprep.mubr.bf16.mxu1 %v1916_v13 }
  0x8f   : > { %1750 = vmatmul.mubr.bf16.vlgmr.msra.gmra.mrb[0].mxu0 %v1915_v12 }
  0x90   : > { %1753 = vmatprep.mubr.bf16.mxu0 %v1916_v13 }
  0x94   : > { %1802 = vmatmul.mubr.bf16.gmra.mrb[4].mxu1 %v1917_v14 }
  0x95   : > { %1805 = vmatprep.mubr.bf16.mxu1 %v1918_v15 }
  0x97   : > { %1754 = vmatmul.mubr.bf16.gmra.mrb[4].mxu0 %v1917_v14 }
  0x98   : > { %1757 = vmatprep.mubr.bf16.mxu0 %v1918_v15 }
  0x9c   : > { %1806 = vmatmul.mubr.bf16.gmra.mrb[8].mxu1 %v1919_v16 }
  0x9d   : > { %1809 = vmatprep.mubr.bf16.mxu1 %v1920_v17 }
  0x9f   : > { %1758 = vmatmul.mubr.bf16.gmra.mrb[8].mxu0 %v1919_v16 }
  0xa0   : > { %1761 = vmatprep.mubr.bf16.mxu0 %v1920_v17 }
  0xa4   : > { %1810 = vmatmul.mubr.bf16.gmra.mrb[12].mxu1 %v1921_v18 }
  0xa5   : > { %1813 = vmatprep.mubr.bf16.mxu1 %v1922_v19 }
  0xa7   : > { %1762 = vmatmul.mubr.bf16.gmra.mrb[12].mxu0 %v1921_v18 }
  0xa8   : > { %1765 = vmatprep.mubr.bf16.mxu0 %v1922_v19 }
  0xac   : > { %1814 = vmatmul.mubr.bf16.gmra.mrb[16].mxu1 %v1923_v20 }
  0xad   : > { %1817 = vmatprep.mubr.bf16.mxu1 %v1924_v21 }
  0xaf   : > { %1766 = vmatmul.mubr.bf16.gmra.mrb[16].mxu0 %v1923_v20 }
  0xb0   : > { %1769 = vmatprep.mubr.bf16.mxu0 %v1924_v21 }
  0xb4   : > { %1818 = vmatmul.mubr.bf16.gmra.mrb[20].mxu1 %v1925_v22 }
  0xb5   : > { %1821 = vmatprep.mubr.bf16.mxu1 %v1926_v23 }
  0xb7   : > { %1770 = vmatmul.mubr.bf16.gmra.mrb[20].mxu0 %v1925_v22 }
  0xb8   : > { %1773 = vmatprep.mubr.bf16.mxu0 %v1926_v23 }
  0xbc   : > { %1822 = vmatmul.mubr.bf16.gmra.mrb[24].mxu1 %v1927_v24 }
  0xbd   : > { %1825 = vmatprep.mubr.bf16.mxu1 %v1928_v25 }
  0xbf   : > { %1774 = vmatmul.mubr.bf16.gmra.mrb[24].mxu0 %v1927_v24 }
  0xc0   : > { %1777 = vmatprep.mubr.bf16.mxu0 %v1928_v25 }
  0xc4   : > { %1826 = vmatmul.mubr.bf16.gmra.mrb[28].mxu1 %v1929_v26 }
  0xc7   : > { %1778 = vmatmul.mubr.bf16.gmra.mrb[28].mxu0 %v1929_v26 }
 0x15f   : > { %v1799_v32 = vpop.f32.mrb[0].mxu1 }
 0x160   : > { %1041 = vst.msk [vmem:[%s2385_s10 + $0x10] sm:$0xff] %vm1038_vm0, %v1799_v32  ;;  %1107 = vrot.lane.b32.xlu1 %v1799_v32, %s2133_s28  ;;  %v751_v33 = vpop.f32.mrb[1].mxu1 }
 0x161   : > { %1039 = vst.msk [vmem:[%s2385_s10] sm:$0xff] %vm1038_vm0, %v751_v33  ;;  %1103 = vrot.lane.b32.xlu0 %v751_v33, %s2133_s28  ;;  %v1800_v34 = vpop.f32.mrb[2].mxu1 }
 0x162   : > { %1042 = vst.msk [vmem:[%s2385_s10 + $0x18] sm:$0xff] %vm1038_vm0, %v1800_v34  ;;  %v754_v35 = vpop.f32.mrb[3].mxu1  ;;  %v1751_v0 = vpop.f32.mrb[0].mxu0 }
 0x163   : > { %1040 = vst.msk [vmem:[%s2385_s10 + $0x8] sm:$0xff] %vm1038_vm0, %v754_v35  ;;  %v526_v1 = vpop.f32.mrb[1].mxu0 }
 0x164   : > { %1109 = vrot.lane.b32.xlu1 %v1800_v34, %s2133_s28  ;;  %v1752_v2 = vpop.f32.mrb[2].mxu0 }
 0x165   : > { %1105 = vrot.lane.b32.xlu0 %v754_v35, %s2133_s28  ;;  %v1598_v3 = vpack.c.bf16 %v1752_v2, %v1751_v0  ;;  %v529_v4 = vpop.f32.mrb[3].mxu0 }
 0x166   : > { %v1593_v5 = vpack.c.bf16 %v529_v4, %v526_v1 }
 0x167   : > { %v1803_v36 = vpop.f32.mrb[4].mxu1  ;;  %1670 = vst [vmem:[%s2485_s13 + $0x8] sm:$0xff] %v1598_v3  }
 0x168   : > { %1045 = vst.msk [vmem:[%s2385_s10 + $0x30] sm:$0xff] %vm1038_vm0, %v1803_v36  ;;  %v767_v37 = vpop.f32.mrb[5].mxu1  ;;  %1594 = vst [vmem:[%s2485_s13] sm:$0xff] %v1593_v5  }
 0x169   : > { %1043 = vst.msk [vmem:[%s2385_s10 + $0x20] sm:$0xff] %vm1038_vm0, %v767_v37  ;;  %1115 = vrot.lane.b32.xlu0 %v1803_v36, %s2133_s28  ;;  %v1804_v38 = vpop.f32.mrb[6].mxu1 }
 0x16a   : > { %1046 = vst.msk [vmem:[%s2385_s10 + $0x38] sm:$0xff] %vm1038_vm0, %v1804_v38  ;;  %1117 = vrot.lane.b32.xlu1 %v1804_v38, %s2133_s28  ;;  %v770_v39 = vpop.f32.mrb[7].mxu1  ;;  %v1755_v6 = vpop.f32.mrb[4].mxu0 }
 0x16b   : > { %1044 = vst.msk [vmem:[%s2385_s10 + $0x28] sm:$0xff] %vm1038_vm0, %v770_v39  ;;  %v542_v8 = vpop.f32.mrb[5].mxu0 }
 0x16c   : > { %v1756_v9 = vpop.f32.mrb[6].mxu0 }
 0x16d   : > { %1111 = vrot.lane.b32.xlu0 %v767_v37, %s2133_s28  ;;  %v1608_v10 = vpack.c.bf16 %v1756_v9, %v1755_v6  ;;  %v545_v11 = vpop.f32.mrb[7].mxu0 }
 0x16e   : > { %1113 = vrot.lane.b32.xlu1 %v770_v39, %s2133_s28  ;;  %v1603_v12 = vpack.c.bf16 %v545_v11, %v542_v8 }
 0x16f   : > { %v1807_v40 = vpop.f32.mrb[8].mxu1  ;;  %1672 = vst [vmem:[%s2485_s13 + $0x18] sm:$0xff] %v1608_v10  }
 0x170   : > { %1049 = vst.msk [vmem:[%s2385_s10 + $0x50] sm:$0xff] %vm1038_vm0, %v1807_v40  ;;  %v783_v41 = vpop.f32.mrb[9].mxu1  ;;  %1671 = vst [vmem:[%s2485_s13 + $0x10] sm:$0xff] %v1603_v12  }
 0x171   : > { %1047 = vst.msk [vmem:[%s2385_s10 + $0x40] sm:$0xff] %vm1038_vm0, %v783_v41  ;;  %1123 = vrot.lane.b32.xlu0 %v1807_v40, %s2133_s28  ;;  %v1808_v42 = vpop.f32.mrb[10].mxu1 }
 0x172   : > { %1050 = vst.msk [vmem:[%s2385_s10 + $0x58] sm:$0xff] %vm1038_vm0, %v1808_v42  ;;  %v786_v43 = vpop.f32.mrb[11].mxu1  ;;  %v1759_v15 = vpop.f32.mrb[8].mxu0 }
 0x173   : > { %1048 = vst.msk [vmem:[%s2385_s10 + $0x48] sm:$0xff] %vm1038_vm0, %v786_v43  ;;  %v558_v17 = vpop.f32.mrb[9].mxu0 }
 0x174   : > { %v1760_v18 = vpop.f32.mrb[10].mxu0 }
 0x175   : > { %1119 = vrot.lane.b32.xlu0 %v783_v41, %s2133_s28  ;;  %v1618_v20 = vpack.c.bf16 %v1760_v18, %v1759_v15  ;;  %v561_v21 = vpop.f32.mrb[11].mxu0 }
 0x176   : > { %v1613_v22 = vpack.c.bf16 %v561_v21, %v558_v17 }
 0x177   : > { %v1811_v44 = vpop.f32.mrb[12].mxu1  ;;  %1674 = vst [vmem:[%s2485_s13 + $0x28] sm:$0xff] %v1618_v20  }
 0x178   : > { %1053 = vst.msk [vmem:[%s2385_s10 + $0x70] sm:$0xff] %vm1038_vm0, %v1811_v44  ;;  %v799_v45 = vpop.f32.mrb[13].mxu1  ;;  %1673 = vst [vmem:[%s2485_s13 + $0x20] sm:$0xff] %v1613_v22  }
 0x179   : > { %1125 = vrot.lane.b32.xlu0 %v1808_v42, %s2133_s28  ;;  %1051 = vst.msk [vmem:[%s2385_s10 + $0x60] sm:$0xff] %vm1038_vm0, %v799_v45  ;;  %v1812_v46 = vpop.f32.mrb[14].mxu1 }
 0x17a   : > { %1054 = vst.msk [vmem:[%s2385_s10 + $0x78] sm:$0xff] %vm1038_vm0, %v1812_v46  ;;  %v802_v47 = vpop.f32.mrb[15].mxu1  ;;  %v1763_v25 = vpop.f32.mrb[12].mxu0 }
 0x17b   : > { %1052 = vst.msk [vmem:[%s2385_s10 + $0x68] sm:$0xff] %vm1038_vm0, %v802_v47  ;;  %v574_v27 = vpop.f32.mrb[13].mxu0 }
 0x17c   : > { %v1764_v28 = vpop.f32.mrb[14].mxu0 }
 0x17d   : > { %1121 = vrot.lane.b32.xlu0 %v786_v43, %s2133_s28  ;;  %v1628_v29 = vpack.c.bf16 %v1764_v28, %v1763_v25  ;;  %v577_v30 = vpop.f32.mrb[15].mxu0 }
 0x17e   : > { %v1623_v31 = vpack.c.bf16 %v577_v30, %v574_v27 }
 0x17f   : > { %v1815_v48 = vpop.f32.mrb[16].mxu1  ;;  %1676 = vst [vmem:[%s2485_s13 + $0x38] sm:$0xff] %v1628_v29  }
 0x180   : > { %1057 = vst.msk [vmem:[%s2385_s10 + $0x90] sm:$0xff] %vm1038_vm0, %v1815_v48  ;;  %v815_v49 = vpop.f32.mrb[17].mxu1  ;;  %1675 = vst [vmem:[%s2485_s13 + $0x30] sm:$0xff] %v1623_v31  }
 0x181   : > { %1131 = vrot.lane.b32.xlu0 %v1811_v44, %s2133_s28  ;;  %1055 = vst.msk [vmem:[%s2385_s10 + $0x80] sm:$0xff] %vm1038_vm0, %v815_v49  ;;  %v1816_v50 = vpop.f32.mrb[18].mxu1 }
 0x182   : > { %1058 = vst.msk [vmem:[%s2385_s10 + $0x98] sm:$0xff] %vm1038_vm0, %v1816_v50  ;;  %1141 = vrot.lane.b32.xlu1 %v1816_v50, %s2133_s28  ;;  %v818_v51 = vpop.f32.mrb[19].mxu1  ;;  %v1767_v34 = vpop.f32.mrb[16].mxu0 }
 0x183   : > { %1056 = vst.msk [vmem:[%s2385_s10 + $0x88] sm:$0xff] %vm1038_vm0, %v818_v51  ;;  %v590_v36 = vpop.f32.mrb[17].mxu0 }
 0x184   : > { %v1768_v37 = vpop.f32.mrb[18].mxu0 }
 0x185   : > { %1127 = vrot.lane.b32.xlu0 %v799_v45, %s2133_s28  ;;  %v1638_v38 = vpack.c.bf16 %v1768_v37, %v1767_v34  ;;  %v593_v39 = vpop.f32.mrb[19].mxu0 }
 0x186   : > { %1137 = vrot.lane.b32.xlu1 %v818_v51, %s2133_s28  ;;  %v1633_v40 = vpack.c.bf16 %v593_v39, %v590_v36 }
 0x187   : > { %v1819_v52 = vpop.f32.mrb[20].mxu1  ;;  %1678 = vst [vmem:[%s2485_s13 + $0x48] sm:$0xff] %v1638_v38  }
 0x188   : > { %1061 = vst.msk [vmem:[%s2385_s10 + $0xb0] sm:$0xff] %vm1038_vm0, %v1819_v52  ;;  %v831_v53 = vpop.f32.mrb[21].mxu1  ;;  %1677 = vst [vmem:[%s2485_s13 + $0x40] sm:$0xff] %v1633_v40  }
 0x189   : > { %1133 = vrot.lane.b32.xlu0 %v1812_v46, %s2133_s28  ;;  %1059 = vst.msk [vmem:[%s2385_s10 + $0xa0] sm:$0xff] %vm1038_vm0, %v831_v53  ;;  %v1820_v54 = vpop.f32.mrb[22].mxu1 }
 0x18a   : > { %1062 = vst.msk [vmem:[%s2385_s10 + $0xb8] sm:$0xff] %vm1038_vm0, %v1820_v54  ;;  %1149 = vrot.lane.b32.xlu1 %v1820_v54, %s2133_s28  ;;  %v834_v55 = vpop.f32.mrb[23].mxu1  ;;  %v1771_v42 = vpop.f32.mrb[20].mxu0 }
 0x18b   : > { %1060 = vst.msk [vmem:[%s2385_s10 + $0xa8] sm:$0xff] %vm1038_vm0, %v834_v55  ;;  %v606_v44 = vpop.f32.mrb[21].mxu0 }
 0x18c   : > { %v1772_v45 = vpop.f32.mrb[22].mxu0 }
 0x18d   : > { %1129 = vrot.lane.b32.xlu0 %v802_v47, %s2133_s28  ;;  %v1648_v46 = vpack.c.bf16 %v1772_v45, %v1771_v42  ;;  %v609_v47 = vpop.f32.mrb[23].mxu0 }
 0x18e   : > { %1145 = vrot.lane.b32.xlu1 %v834_v55, %s2133_s28 }
 0x18f   : > { %v1823_v56 = vpop.f32.mrb[24].mxu1  ;;  %1680 = vst [vmem:[%s2485_s13 + $0x58] sm:$0xff] %v1648_v46  }
 0x190   : > { %1065 = vst.msk [vmem:[%s2385_s10 + $0xd0] sm:$0xff] %vm1038_vm0, %v1823_v56  ;;  %v847_v57 = vpop.f32.mrb[25].mxu1 }
 0x191   : > { %1139 = vrot.lane.b32.xlu0 %v1815_v48, %s2133_s28  ;;  %1063 = vst.msk [vmem:[%s2385_s10 + $0xc0] sm:$0xff] %vm1038_vm0, %v847_v57  ;;  %v1824_v58 = vpop.f32.mrb[26].mxu1  ;;  %v1643_v48 = vpack.c.bf16 %v609_v47, %v606_v44 }
 0x192   : > { %1155 = vrot.lane.b32.xlu1 %v1823_v56, %s2133_s28  ;;  %1066 = vst.msk [vmem:[%s2385_s10 + $0xd8] sm:$0xff] %vm1038_vm0, %v1824_v58  ;;  %v850_v59 = vpop.f32.mrb[27].mxu1  ;;  %v1775_v51 = vpop.f32.mrb[24].mxu0 }
 0x193   : > { %1064 = vst.msk [vmem:[%s2385_s10 + $0xc8] sm:$0xff] %vm1038_vm0, %v850_v59  ;;  %1679 = vst [vmem:[%s2485_s13 + $0x50] sm:$0xff] %v1643_v48  }
 0x195   : > { %1135 = vrot.lane.b32.xlu0 %v815_v49, %s2133_s28 }
 0x196   : > { %1151 = vrot.lane.b32.xlu1 %v847_v57, %s2133_s28 }
 0x197   : > { %v1827_v60 = vpop.f32.mrb[28].mxu1 }
 0x198   : > { %1069 = vst.msk [vmem:[%s2385_s10 + $0xf0] sm:$0xff] %vm1038_vm0, %v1827_v60  ;;  %v863_v61 = vpop.f32.mrb[29].mxu1 }
 0x199   : > { %1147 = vrot.lane.b32.xlu0 %v1819_v52, %s2133_s28  ;;  %1067 = vst.msk [vmem:[%s2385_s10 + $0xe0] sm:$0xff] %vm1038_vm0, %v863_v61  ;;  %v1828_v62 = vpop.f32.mrb[30].mxu1 }
 0x19a   : > { %1157 = vrot.lane.b32.xlu1 %v1824_v58, %s2133_s28  ;;  %1070 = vst.msk [vmem:[%s2385_s10 + $0xf8] sm:$0xff] %vm1038_vm0, %v1828_v62  ;;  %v866_v63 = vpop.f32.mrb[31].mxu1 }
 0x19b   : > { %1068 = vst.msk [vmem:[%s2385_s10 + $0xe8] sm:$0xff] %vm1038_vm0, %v866_v63 }
 0x19d   : > { %1143 = vrot.lane.b32.xlu0 %v831_v53, %s2133_s28  ;;  %v622_v53 = vpop.f32.mrb[25].mxu0 }
 0x19e   : > { %1153 = vrot.lane.b32.xlu1 %v850_v59, %s2133_s28  ;;  %v1776_v54 = vpop.f32.mrb[26].mxu0 }
 0x19f   : > { %v1658_v55 = vpack.c.bf16 %v1776_v54, %v1775_v51  ;;  %v625_v56 = vpop.f32.mrb[27].mxu0 }
 0x1a0   : > { %v1653_v57 = vpack.c.bf16 %v625_v56, %v622_v53 }
 0x1a1   : > { %1682 = vst [vmem:[%s2485_s13 + $0x68] sm:$0xff] %v1658_v55  }
 0x1a2   : > { %1163 = vrot.lane.b32.xlu1 %v1827_v60, %s2133_s28  ;;  %1681 = vst [vmem:[%s2485_s13 + $0x60] sm:$0xff] %v1653_v57   ;;  %v1779_v60 = vpop.f32.mrb[28].mxu0 }
 0x1a6   : > { %1159 = vrot.lane.b32.xlu1 %v863_v61, %s2133_s28 }
 0x1aa   : > { %1165 = vrot.lane.b32.xlu1 %v1828_v62, %s2133_s28  ;;  %v638_v62 = vpop.f32.mrb[29].mxu0 }
 0x1ae   : > { %1161 = vrot.lane.b32.xlu1 %v866_v63, %s2133_s28  ;;  %v1780_v63 = vpop.f32.mrb[30].mxu0 }
 0x1af   : > { %v1668_v1 = vpack.c.bf16 %v1780_v63, %v1779_v60  ;;  %v641_v2 = vpop.f32.mrb[31].mxu0 }
 0x1b0   : > { %v1663_v3 = vpack.c.bf16 %v641_v2, %v638_v62 }
 0x1b1   : > { %1684 = vst [vmem:[%s2485_s13 + $0x78] sm:$0xff] %v1668_v1  }
 0x1b2   : > { %1683 = vst [vmem:[%s2485_s13 + $0x70] sm:$0xff] %v1663_v3  }
 0x1d2   : > { %v1108_v13 = vpop.permute.xlu1 %1107 }
 0x1d3   : > { %v1104_v7 = vpop.permute.xlu0 %1103 }
 0x1d4   : > { %1199 = vxpose.xlu0.b32.start [1/16] (narrow) %v1104_v7, 8 }
 0x1d6   : > { %v1110_v19 = vpop.permute.xlu1 %1109 }
 0x1d7   : > { %v1106_v14 = vpop.permute.xlu0 %1105 }
 0x1d8   : > { %1200 = vxpose.xlu0.b32.cont [2/16] (narrow) %v1106_v14, 8 }
 0x1db   : > { %v1116_v16 = vpop.permute.xlu0 %1115 }
 0x1dc   : > { %1201 = vxpose.xlu0.b32.cont [3/16] (narrow) %v1108_v13, 8  ;;  %v1118_v24 = vpop.permute.xlu1 %1117 }
 0x1df   : > { %v1112_v23 = vpop.permute.xlu0 %1111 }
 0x1e0   : > { %1202 = vxpose.xlu0.b32.cont [4/16] (narrow) %v1110_v19, 8  ;;  %v1114_v32 = vpop.permute.xlu1 %1113 }
 0x1e3   : > { %v1124_v26 = vpop.permute.xlu0 %1123 }
 0x1e4   : > { %1203 = vxpose.xlu0.b32.cont [5/16] (narrow) %v1112_v23, 8 }
 0x1e7   : > { %v1120_v33 = vpop.permute.xlu0 %1119 }
 0x1e8   : > { %1204 = vxpose.xlu0.b32.cont [6/16] (narrow) %v1114_v32, 8 }
 0x1eb   : > { %v1126_v35 = vpop.permute.xlu0 %1125 }
 0x1ec   : > { %1205 = vxpose.xlu0.b32.cont [7/16] (narrow) %v1116_v16, 8 }
 0x1ef   : > { %v1122_v41 = vpop.permute.xlu0 %1121 }
 0x1f0   : > { %1206 = vxpose.xlu0.b32.cont [8/16] (narrow) %v1118_v24, 8 }
 0x1f3   : > { %v1132_v43 = vpop.permute.xlu0 %1131 }
 0x1f4   : > { %1207 = vxpose.xlu0.b32.cont [9/16] (narrow) %v1120_v33, 8  ;;  %v2499_v50 = vpop.permute.xlu1 %1141 }
 0x1f7   : > { %v1128_v49 = vpop.permute.xlu0 %1127 }
 0x1f8   : > { %1208 = vxpose.xlu0.b32.cont [10/16] (narrow) %v1122_v41, 8  ;;  %v1138_v59 = vpop.permute.xlu1 %1137 }
 0x1fb   : > { %v1134_v52 = vpop.permute.xlu0 %1133 }
 0x1fc   : > { %1209 = vxpose.xlu0.b32.cont [11/16] (narrow) %v1124_v26, 8  ;;  %v1150_v0 = vpop.permute.xlu1 %1149 }
 0x1ff   : > { %v1130_v58 = vpop.permute.xlu0 %1129 }
 0x200   : > { %1210 = vxpose.xlu0.b32.cont [12/16] (narrow) %v1126_v35, 8  ;;  %v1146_v5 = vpop.permute.xlu1 %1145 }
 0x203   : > { %v1140_v61 = vpop.permute.xlu0 %1139 }
 0x204   : > { %1211 = vxpose.xlu0.b32.cont [13/16] (narrow) %v1128_v49, 8 }
 0x207   : > { %v1136_v4 = vpop.permute.xlu0 %1135 }
 0x208   : > { %1212 = vxpose.xlu0.b32.cont [14/16] (narrow) %v1130_v58, 8  ;;  %1231 = vxpose.xlu1.b32.start [1/16] (narrow) %v1136_v4, 8 }
 0x20c   : > { %1213 = vxpose.xlu0.b32.cont [15/16] (narrow) %v1132_v43, 8  ;;  %1232 = vxpose.xlu1.b32.cont [2/16] (narrow) %v1138_v59, 8 }
 0x20d   : > { %2037 = shalt.err (!%p2034_p13)
}
 0x20e   : > { %s2038_s15 = scalar_lea.hbm %s2510_s7, 2048  ;;  %s2042_s28 = scalar_lea.hbm %s2591_s3, 4096 }
 0x20f   : > { %p2039_p6 = scmp.ne.s32.totalorder %s2510_s7, %s2038_s15  ;;  %p2043_p5 = scmp.lt.u32.totalorder %s2510_s7, %s2591_s3 }
 0x210   : > { %p2044_p8 = scmp.lt.u32.totalorder %s2042_s28, %s2038_s15  ;;  %p2046_p0 = scmp.lt.u32.totalorder %s2038_s15, %s2510_s7 }
 0x211   : > { %p2040_p10 = pnand %p2039_p6, %p2607_p2 }
 0x212   : > { %p2045_p11 = por %p2044_p8, %p2043_p5 }
 0x213   : > { %p2041_p4 = pneg %p2040_p10 }
 0x214   : > { %p2047_p3 = por %p2046_p0, %p2045_p11 }
 0x216   : > { %p2048_p7 = pnand %p2047_p3, %p2041_p4 }
 0x218   : > { %2051 = shalt.err (!%p2048_p7)
}
 0x219   : > { %s2135_s11 = smov 64   ;;  %s2136_s17 = smov 4   ;;  %1214 = vxpose.xlu0.b32.end [16/16] (narrow) %v1134_v52, 8  ;;  %1233 = vxpose.xlu1.b32.cont [3/16] (narrow) %v1140_v61, 8  ;;  %v1148_v6 = vpop.permute.xlu0 %1147  ;;  %v1156_v7 = vpop.permute.xlu1 %1155 }
 0x21a   : > { %1839 = dma.vmem_to_hbm [thread:$0]  (%p2607_p2), %s2512_s30, 2048, %s2510_s7, %s1276_s6, %s2135_s11, %s2135_s11, %s2136_s17  }
 0x21b   : > { %s1479_s30 = sshll.u32 %s2349_s14, 2  ;;  %s1589_s7 = sshll.u32 %s2189_s22, 6 }
 0x21c   : > { %s289_s6 = scalar_lea.vmem [#allocation9], %s1479_s30  ;;  %s2544_s26 = scalar_lea.hbm %s2593_s5, %s1589_s7 }
 0x21d   : > { %1234 = vxpose.xlu1.b32.cont [4/16] (narrow) %v2499_v50, 8  ;;  %v1144_v8 = vpop.permute.xlu0 %1143  ;;  %v1152_v9 = vpop.permute.xlu1 %1151  ;;  %s1320_s8 = sshll.u32 %s289_s6, 4  ;;  %s1286_s15 = scalar_lea.sflag [#allocation10], %s2349_s14  ;;  %s2546_s8 = int_to_ptr.vmem [resolvable:$true] %s1320_s8 }
 0x21e   : > { %s2052_s16 = scalar_lea.vmem %s2546_s8, 64  ;;  %s2137_s22 = smov [#allocation9]  }
 0x21f   : > { %p2053_p9 = scmp.ne.s32.totalorder %s2546_s8, %s2052_s16  ;;  %s2056_s10 = sshll.u32 %s2137_s22, 4  ;;  %s2057_s10 = int_to_ptr.vmem [resolvable:$false] %s2056_s10 }
 0x220   : > { %s2058_s28 = scalar_lea.vmem %s2057_s10, 128  ;;  %p2059_p13 = scmp.lt.s32.totalorder %s2546_s8, %s2057_s10 }
 0x221   : > { %1235 = vxpose.xlu1.b32.cont [5/16] (narrow) %v1144_v8, 8  ;;  %v1158_v10 = vpop.permute.xlu1 %1157  ;;  %p2054_p12 = pnand %p2053_p9, %p2607_p2  ;;  %p2060_p6 = scmp.lt.s32.totalorder %s2058_s28, %s2052_s16 }
 0x223   : > { %p2055_p1 = pneg %p2054_p12  ;;  %p2061_p10 = por %p2060_p6, %p2059_p13 }
 0x225   : > { %1236 = vxpose.xlu1.b32.cont [6/16] (narrow) %v1146_v5, 8  ;;  %v1154_v11 = vpop.permute.xlu1 %1153  ;;  %p2062_p4 = pnand %p2061_p10, %p2055_p1 }
 0x229   : > { %1237 = vxpose.xlu1.b32.cont [7/16] (narrow) %v1148_v6, 8  ;;  %v1164_v12 = vpop.permute.xlu1 %1163 }
 0x22d   : > { %1238 = vxpose.xlu1.b32.cont [8/16] (narrow) %v1150_v0, 8  ;;  %v1160_v13 = vpop.permute.xlu1 %1159 }
 0x231   : > { %1239 = vxpose.xlu1.b32.cont [9/16] (narrow) %v1152_v9, 8  ;;  %v1166_v14 = vpop.permute.xlu1 %1165 }
 0x235   : > { %1240 = vxpose.xlu1.b32.cont [10/16] (narrow) %v1154_v11, 8  ;;  %v1162_v15 = vpop.permute.xlu1 %1161 }
 0x239   : > { %1241 = vxpose.xlu1.b32.cont [11/16] (narrow) %v1156_v7, 8 }
 0x23d   : > { %1242 = vxpose.xlu1.b32.cont [12/16] (narrow) %v1158_v10, 8 }
 0x241   : > { %1243 = vxpose.xlu1.b32.cont [13/16] (narrow) %v1160_v13, 8 }
 0x245   : > { %1244 = vxpose.xlu1.b32.cont [14/16] (narrow) %v1162_v15, 8 }
 0x249   : > { %1245 = vxpose.xlu1.b32.cont [15/16] (narrow) %v1164_v12, 8 }
 0x24d   : > { %1246 = vxpose.xlu1.b32.end [16/16] (narrow) %v1166_v14, 8 }
 0x25d   : > { %v1215_v16 = vpop.trf.xlu0 }
 0x291   : > { %v1247_v17 = vpop.trf.xlu1 }
 0x292   : > { %v1265_v18 = vcombine.low %v1215_v16, %v1247_v17 }
 0x294   : > { %1546 = vst.sshfl [vmem:[%s289_s6] sm:$0x33 pattern:$0x76325410] %v1265_v18 }
 0x295   : > { %2065 = shalt.err (!%p2062_p4)
}
 0x296   : > { %s2066_s14 = scalar_lea.hbm %s2544_s26, 64  ;;  %s2070_s11 = scalar_lea.hbm %s2593_s5, 128 }
 0x297   : > { %p2067_p5 = scmp.ne.s32.totalorder %s2544_s26, %s2066_s14  ;;  %p2071_p0 = scmp.lt.u32.totalorder %s2544_s26, %s2593_s5 }
 0x298   : > { %p2072_p3 = scmp.lt.u32.totalorder %s2070_s11, %s2066_s14  ;;  %p2074_p9 = scmp.lt.u32.totalorder %s2066_s14, %s2544_s26 }
 0x299   : > { %p2068_p8 = pnand %p2067_p5, %p2607_p2 }
 0x29a   : > { %p2073_p7 = por %p2072_p3, %p2071_p0 }
 0x29b   : > { %p2069_p11 = pneg %p2068_p8 }
 0x29c   : > { %p2075_p12 = por %p2074_p9, %p2073_p7 }
 0x29e   : > { %p2076_p1 = pnand %p2075_p12, %p2069_p11 }
 0x2a0   : > { %2079 = shalt.err (!%p2076_p1)
}
 0x2a1   : > { %1840 = dma.vmem_to_hbm [thread:$0]  (%p2607_p2), %s2546_s8, 64, %s2544_s26, %s1286_s15  }
 0x2a2 PF: > { %s1332_s7 = sand.u32 1, %s2114_s18   ;;  %p2608_p13 = scmp.ne.s32.totalorder %s2598_s25, 0 }
 0x2a3   : > { %p2609_p6 = scmp.ge.s32.totalorder %s2126_s21, 2  ;;  %s1333_s6 = scalar_lea.sflag [#allocation4], %s1332_s7 }
 0x2a5   : > { %p1855_p10 = pnand %p2609_p6, %p2608_p13 }
 0x2a7   : > { %2105 = dma.done.wait (!%p1855_p10), %s1333_s6, 2048  }
 0x2a8   : > { %2107 = vsyncadd (!%p1855_p10), %s1333_s6, 4294965248  ;;  %s1350_s12 = scalar_lea.sflag [#allocation10], %s1332_s7 }
 0x2a9   : > { %2109 = dma.done.wait (!%p1855_p10), %s1350_s12, 64  }
 0x2aa   : > { %2111 = vsyncadd (!%p1855_p10), %s1350_s12, 4294967232  ;;  %p23_p2 = scmp.ge.s32.totalorder %s2284_s29, 4   ;;  %s2610_s18 = smov %s2118_s19 }
 0x2ab   : > { %s2611_s19 = smov %s2122_s20  ;;  %s2612_s20 = smov %s2300_s27 }
 0x2ac   : > { %s2613_s21 = smov %s2284_s29  ;;  %25 = sbr.rel (!%p23_p2) target bundleno = 8 (0x8), region = 114 }
 0x2b3   :  { %1355 = vsyncpa [#allocation3], 1 }
 0x2b4   :  { %1357 = vsyncpa [#allocation3 + $0x1], 1 }
 0x2b5   :  { %1358 = vsyncpa [#allocation6], 1 }
 0x2b6   :  { %1359 = vsyncpa [#allocation4], 1 }
 0x2b7   :  { %1361 = vsyncpa [#allocation4 + $0x1], 1 }
 0x2b8   :  { %1362 = vsyncpa [#allocation10], 1 }
 0x2b9   :  { %1364 = vsyncpa [#allocation10 + $0x1], 1 }

</bundles_post_ra>
